<compile_context>
chip_gen: v7x
topology: tpu7x:2x2x1
jax: 0.10.0
libtpu: 0.0.40
codegen_flags: <defaults>
</compile_context>

<pallas_src>
import jax
import jax.numpy as jnp
from jax.experimental import pallas as pl
from jax.experimental.pallas import tpu as pltpu


def lstm_kernel(xp_ref, whh_ref, out_ref, h_scr, c_scr):
    """One grid step = one (batch block, time chunk) of the LSTM recurrence.

    xp_ref : (TC, TB, 4H) f32   precomputed x_t @ W_ih^T + (b_ih+b_hh), time-major
    whh_ref: (H, 4H)      bf16  W_hh^T (resident across the grid)
    out_ref: (TB, H)      f32   h at the final time step (written on last chunk)
    h_scr, c_scr: (TB, H) f32   recurrent state carried across time chunks
    """
    chunk = pl.program_id(1)
    TC = xp_ref.shape[0]
    H = h_scr.shape[-1]

    @pl.when(chunk == 0)
    def _init():
        h_scr[...] = jnp.zeros_like(h_scr)
        c_scr[...] = jnp.zeros_like(c_scr)

    whh = whh_ref[...]                         # (H, 4H) bf16, loaded once per chunk

    def step(t, carry):
        h, c = carry                           # (TB, H) f32
        # Recurrent projection: bf16 MXU operands, f32 accumulation.
        rec = jnp.dot(h.astype(jnp.bfloat16), whh,
                      preferred_element_type=jnp.float32)          # (TB, 4H)
        gates = xp_ref[t] + rec                # bias already folded into xp

        # sigmoid(x) = 0.5*tanh(0.5*x) + 0.5: one EUP tanh over the full
        # (TB, 4H) vreg width replaces three exp+reciprocal sigmoids on
        # narrow H-lane slices; one more tanh for the g slice, one for c.
        sg = 0.5 * jnp.tanh(0.5 * gates) + 0.5
        i_g = sg[:, 0:H]
        f_g = sg[:, H:2 * H]
        o_g = sg[:, 3 * H:4 * H]
        g_g = jnp.tanh(gates[:, 2 * H:3 * H])

        c = f_g * c + i_g * g_g
        h = o_g * jnp.tanh(c)
        return (h, c)

    # Steps are serially dependent: partial unroll keeps the scheduler's
    # MXU/EUP overlap without bloating the bundle stream at large chunks.
    unroll = TC if TC <= 8 else 8
    h_f, c_f = jax.lax.fori_loop(0, TC, step, (h_scr[...], c_scr[...]),
                                 unroll=unroll)

    h_scr[...] = h_f
    c_scr[...] = c_f

    @pl.when(chunk == pl.num_programs(1) - 1)
    def _finalize():
        out_ref[...] = h_f.astype(out_ref.dtype)


def text_encoder_forward(tokens, embedding, w_ih, w_hh, b_ih, b_hh,
                         *, time_chunk=None, batch_block=None,
                         vmem_budget_bytes=None):
    """tokens: (B, T) int32.  Returns h[-1]: (B, H) float32."""
    B, T = tokens.shape
    _, E = embedding.shape
    H = w_hh.shape[1]
    G = 4 * H

    # Per-chip VMEM budget: ~75% of physical (96 MiB on v5e/v6e, 48 MiB on
    # v7x's 64 MiB), with a conservative fallback if the query is unavailable.
    if vmem_budget_bytes is None:
        try:
            phys = int(pltpu.get_tpu_info().vmem_capacity_bytes)
        except Exception:  # pragma: no cover - conservative fallback
            phys = 64 * 1024 * 1024
        vmem_budget_bytes = min(int(phys * 3 // 4), 96 * 1024 * 1024)

    # Pad batch to the f32 sublane tile (8): fills vregs / MXU rows and makes
    # block shapes tile-legal.  Padded rows are sliced off at the end.
    B_pad = max(8, ((B + 7) // 8) * 8)
    if B_pad != B:
        tokens = jnp.pad(tokens, ((0, B_pad - B), (0, 0)))

    # --- JAX-side glue ------------------------------------------------------
    # Embedding gather (plain XLA).
    # TODO(synk): fuse the gather + input projection into a Pallas kernel with
    # scalar-prefetched token ids once vocab/T reach production scale.
    x = embedding[tokens]                                          # (B_pad, T, E)

    # Hoisted input projection: ONE big bf16 MXU GEMM (f32 accumulation) over
    # all time steps, emitted directly time-major so no extra transpose /
    # HBM round trip of the largest intermediate is needed.
    xp = jnp.einsum('bte,ge->tbg',
                    x.astype(jnp.bfloat16), w_ih.astype(jnp.bfloat16),
                    preferred_element_type=jnp.float32)
    xp = (xp + (b_ih + b_hh)).astype(jnp.float32)                  # (T, B_pad, 4H)

    # Recurrent weight, pre-transposed; bf16 MXU operand (f32 accumulation and
    # f32 state / nonlinearities inside the kernel).
    whh_t = jnp.transpose(w_hh).astype(jnp.bfloat16)               # (H, 4H)

    # Batch blocking: one block for small batch; split into two blocks when
    # batch allows so v7x's two TensorCores each run an independent shard of
    # the recurrence (neutral on single-TC v5e/v6e).
    if batch_block is None:
        batch_block = B_pad // 2 if (B_pad % 16 == 0) else B_pad
    assert B_pad % batch_block == 0 and batch_block % 8 == 0
    n_bblocks = B_pad // batch_block

    # Time chunk: largest divisor of T whose double-buffered xp block fits the
    # VMEM budget (minus resident W_hh, h/c state, output, small headroom).
    if time_chunk is None:
        xp_step_bytes = batch_block * G * 4
        resident = 2 * (H * G * 2) + 4 * (batch_block * H * 4) + (1 << 20)
        cap = max(1, (vmem_budget_bytes - resident) // (2 * xp_step_bytes))
        cap = min(cap, 512)
        time_chunk = max(d for d in range(1, T + 1) if T % d == 0 and d <= cap)
    assert T % time_chunk == 0, "time_chunk must divide T"
    n_chunks = T // time_chunk

    out_padded = pl.pallas_call(
        lstm_kernel,
        out_shape=jax.ShapeDtypeStruct((B_pad, H), jnp.float32),
        grid_spec=pltpu.PrefetchScalarGridSpec(
            num_scalar_prefetch=0,
            grid=(n_bblocks, n_chunks),
            in_specs=[
                # xp block: (time chunk, batch block, all gates)
                pl.BlockSpec((time_chunk, batch_block, G),
                             lambda b, i: (i, b, 0)),
                # Resident recurrent weight: constant index_map, reused every
                # step.  TODO(synk): single-buffer via pipeline_mode at
                # production H; negligible at H=32.
                pl.BlockSpec((H, G), lambda b, i: (0, 0)),
            ],
            out_specs=pl.BlockSpec((batch_block, H), lambda b, i: (b, 0)),
            scratch_shapes=[
                pltpu.VMEM((batch_block, H), jnp.float32),   # h state
                pltpu.VMEM((batch_block, H), jnp.float32),   # c state
            ],
        ),
        compiler_params=pltpu.CompilerParams(
            dimension_semantics=("parallel", "arbitrary"),
            vmem_limit_bytes=int(vmem_budget_bytes),
        ),
    )(xp, whh_t)

    return out_padded[:B]


def lstm_reference(tokens, embedding, w_ih, w_hh, b_ih, b_hh):
    """Pure-JAX f32 reference matching torch.nn.LSTM(batch_first=True)."""
    B, _ = tokens.shape
    H = w_hh.shape[1]
    x = embedding[tokens]                      # (B, T, E)
    x_tbe = jnp.transpose(x, (1, 0, 2))        # (T, B, E)

    def step(carry, x_t):
        h, c = carry
        gates = x_t @ w_ih.T + h @ w_hh.T + b_ih + b_hh
        i_g, f_g, g_g, o_g = jnp.split(gates, 4, axis=-1)
        i_g = jax.nn.sigmoid(i_g)
        f_g = jax.nn.sigmoid(f_g)
        g_g = jnp.tanh(g_g)
        o_g = jax.nn.sigmoid(o_g)
        c = f_g * c + i_g * g_g
        h = o_g * jnp.tanh(c)
        return (h, c), None

    h0 = jnp.zeros((B, H), jnp.float32)
    c0 = jnp.zeros((B, H), jnp.float32)
    (h, _), _ = jax.lax.scan(step, (h0, c0), x_tbe)
    return h


if __name__ == "__main__":
    # Small shapes consistent with the module.
    VOCAB, EMBED, HIDDEN = 50, 32, 32
    BATCH, SEQ = 2, 8

    key = jax.random.PRNGKey(0)
    k_tok, k_emb, k_wih, k_whh, k_bih, k_bhh = jax.random.split(key, 6)

    # Deterministic parameter init (shapes match nn.Embedding / nn.LSTM).
    scale = 1.0 / jnp.sqrt(HIDDEN)
    embedding = jax.random.normal(k_emb, (VOCAB, EMBED), jnp.float32)
    w_ih = jax.random.uniform(k_wih, (4 * HIDDEN, EMBED), jnp.float32, -scale, scale)
    w_hh = jax.random.uniform(k_whh, (4 * HIDDEN, HIDDEN), jnp.float32, -scale, scale)
    b_ih = jax.random.uniform(k_bih, (4 * HIDDEN,), jnp.float32, -scale, scale)
    b_hh = jax.random.uniform(k_bhh, (4 * HIDDEN,), jnp.float32, -scale, scale)

    tokens = jax.random.randint(k_tok, (BATCH, SEQ), 0, VOCAB, jnp.int32)

    h_last = jax.jit(text_encoder_forward)(tokens, embedding, w_ih, w_hh, b_ih, b_hh)
    h_last = jax.block_until_ready(h_last)

    h_ref = lstm_reference(tokens, embedding, w_ih, w_hh, b_ih, b_hh)
    assert h_last.shape == (BATCH, HIDDEN)
    # Tolerance accounts for bf16 MXU operands in both the hoisted input GEMM
    # and the recurrent matmul (f32 accumulation everywhere); gate-order /
    # recurrence errors would be O(0.1+).
    assert jnp.allclose(h_last, h_ref, atol=5e-2, rtol=5e-2), "mismatch vs reference"

    print("KERNEL_OK")
</pallas_src>

<mosaic_0001>
module attributes {stable_mosaic.version = 11 : i64} {
  func.func @lstm_kernel(%arg0: i32, %arg1: i32, %arg2: memref<8x8x128xf32, #tpu.memory_space<vmem>>, %arg3: memref<32x128xbf16, #tpu.memory_space<vmem>>, %arg4: memref<8x32xf32, #tpu.memory_space<vmem>>, %arg5: memref<8x32xf32, #tpu.memory_space<vmem>>, %arg6: memref<8x32xf32, #tpu.memory_space<vmem>>) attributes {dimension_semantics = [#tpu.dimension_semantics<parallel>, #tpu.dimension_semantics<arbitrary>], iteration_bounds = array<i64: 1, 1>, scalar_prefetch = 0 : i64, scratch_operands = 2 : i64, tpu.core_type = #tpu.core_type<tc>, window_params = [{transform_indices = @transform_0, window_bounds = array<i64: 8, 8, 128>}, {pipeline_mode = #tpu.pipeline_mode<synchronous>, transform_indices = @transform_1, window_bounds = array<i64: 32, 128>}, {transform_indices = @transform_2, window_bounds = array<i64: 8, 32>}]} {
    %c0_i32 = arith.constant 0 : i32
    %0 = arith.cmpi eq, %arg1, %c0_i32 : i32
    %1 = arith.extui %0 : i1 to i32
    %c0_i32_0 = arith.constant 0 : i32
    %2 = arith.cmpi ne, %1, %c0_i32_0 : i32
    scf.if %2 {
      %cst_60 = arith.constant 0.000000e+00 : f32
      %195 = vector.broadcast %cst_60 : f32 to vector<8x32xf32>
      %c0_61 = arith.constant 0 : index
      %c0_62 = arith.constant 0 : index
      %196 = vector.load %arg5[%c0_61, %c0_62] : memref<8x32xf32, #tpu.memory_space<vmem>>, vector<8x32xf32>
      tpu.vector_store %arg5[%c0_61, %c0_62], %195 {strides = array<i32>} : memref<8x32xf32, #tpu.memory_space<vmem>>, vector<8x32xf32>,
      %cst_63 = arith.constant 0.000000e+00 : f32
      %197 = vector.broadcast %cst_63 : f32 to vector<8x32xf32>
      %c0_64 = arith.constant 0 : index
      %c0_65 = arith.constant 0 : index
      %198 = vector.load %arg6[%c0_64, %c0_65] : memref<8x32xf32, #tpu.memory_space<vmem>>, vector<8x32xf32>
      tpu.vector_store %arg6[%c0_64, %c0_65], %197 {strides = array<i32>} : memref<8x32xf32, #tpu.memory_space<vmem>>, vector<8x32xf32>,
    } else {
    }
    %c0 = arith.constant 0 : index
    %c0_1 = arith.constant 0 : index
    %3 = vector.load %arg3[%c0, %c0_1] : memref<32x128xbf16, #tpu.memory_space<vmem>>, vector<32x128xbf16>
    %c0_2 = arith.constant 0 : index
    %c0_3 = arith.constant 0 : index
    %4 = vector.load %arg5[%c0_2, %c0_3] : memref<8x32xf32, #tpu.memory_space<vmem>>, vector<8x32xf32>
    %c0_4 = arith.constant 0 : index
    %c0_5 = arith.constant 0 : index
    %5 = vector.load %arg6[%c0_4, %c0_5] : memref<8x32xf32, #tpu.memory_space<vmem>>, vector<8x32xf32>
    %c0_i32_6 = arith.constant 0 : i32
    %6 = arith.truncf %4 : vector<8x32xf32> to vector<8x32xbf16>
    %cst = arith.constant dense<0.000000e+00> : vector<8x128xf32>
    %7 = tpu.matmul %6, %3, %cst {dimension_numbers = #tpu.dot_dimension_numbers<[1], [0], [0], [1], [0, 0, 1, 1], [], []>} : vector<8x32xbf16>, vector<32x128xbf16>, vector<8x128xf32> -> vector<8x128xf32>
    %8 = arith.index_cast %c0_i32_6 : i32 to index
    %c0_7 = arith.constant 0 : index
    %c0_8 = arith.constant 0 : index
    %9 = vector.load %arg2[%8, %c0_7, %c0_8] : memref<8x8x128xf32, #tpu.memory_space<vmem>>, vector<1x8x128xf32>
    %10 = vector.shape_cast %9 : vector<1x8x128xf32> to vector<8x128xf32>
    %11 = arith.addf %10, %7 : vector<8x128xf32>
    %cst_9 = arith.constant 5.000000e-01 : f32
    %12 = vector.broadcast %cst_9 : f32 to vector<8x128xf32>
    %13 = arith.mulf %12, %11 : vector<8x128xf32>
    %14 = math.tanh %13 : vector<8x128xf32>
    %cst_10 = arith.constant 5.000000e-01 : f32
    %15 = vector.broadcast %cst_10 : f32 to vector<8x128xf32>
    %16 = arith.mulf %15, %14 : vector<8x128xf32>
    %cst_11 = arith.constant 5.000000e-01 : f32
    %17 = vector.broadcast %cst_11 : f32 to vector<8x128xf32>
    %18 = arith.addf %16, %17 : vector<8x128xf32>
    %19 = vector.extract_strided_slice %18 {offsets = [0, 0], sizes = [8, 32], strides = [1, 1]} : vector<8x128xf32> to vector<8x32xf32>
    %20 = vector.extract_strided_slice %18 {offsets = [0, 32], sizes = [8, 32], strides = [1, 1]} : vector<8x128xf32> to vector<8x32xf32>
    %21 = vector.extract_strided_slice %18 {offsets = [0, 96], sizes = [8, 32], strides = [1, 1]} : vector<8x128xf32> to vector<8x32xf32>
    %22 = vector.extract_strided_slice %11 {offsets = [0, 64], sizes = [8, 32], strides = [1, 1]} : vector<8x128xf32> to vector<8x32xf32>
    %23 = math.tanh %22 : vector<8x32xf32>
    %24 = arith.mulf %20, %5 : vector<8x32xf32>
    %25 = arith.mulf %19, %23 : vector<8x32xf32>
    %26 = arith.addf %24, %25 : vector<8x32xf32>
    %27 = math.tanh %26 : vector<8x32xf32>
    %28 = arith.mulf %21, %27 : vector<8x32xf32>
    %c1_i32 = arith.constant 1 : i32
    %29 = arith.truncf %28 : vector<8x32xf32> to vector<8x32xbf16>
    %cst_12 = arith.constant dense<0.000000e+00> : vector<8x128xf32>
    %30 = tpu.matmul %29, %3, %cst_12 {dimension_numbers = #tpu.dot_dimension_numbers<[1], [0], [0], [1], [0, 0, 1, 1], [], []>} : vector<8x32xbf16>, vector<32x128xbf16>, vector<8x128xf32> -> vector<8x128xf32>
    %31 = arith.index_cast %c1_i32 : i32 to index
    %c0_13 = arith.constant 0 : index
    %c0_14 = arith.constant 0 : index
    %32 = vector.load %arg2[%31, %c0_13, %c0_14] : memref<8x8x128xf32, #tpu.memory_space<vmem>>, vector<1x8x128xf32>
    %33 = vector.shape_cast %32 : vector<1x8x128xf32> to vector<8x128xf32>
    %34 = arith.addf %33, %30 : vector<8x128xf32>
    %cst_15 = arith.constant 5.000000e-01 : f32
    %35 = vector.broadcast %cst_15 : f32 to vector<8x128xf32>
    %36 = arith.mulf %35, %34 : vector<8x128xf32>
    %37 = math.tanh %36 : vector<8x128xf32>
    %cst_16 = arith.constant 5.000000e-01 : f32
    %38 = vector.broadcast %cst_16 : f32 to vector<8x128xf32>
    %39 = arith.mulf %38, %37 : vector<8x128xf32>
    %cst_17 = arith.constant 5.000000e-01 : f32
    %40 = vector.broadcast %cst_17 : f32 to vector<8x128xf32>
    %41 = arith.addf %39, %40 : vector<8x128xf32>
    %42 = vector.extract_strided_slice %41 {offsets = [0, 0], sizes = [8, 32], strides = [1, 1]} : vector<8x128xf32> to vector<8x32xf32>
    %43 = vector.extract_strided_slice %41 {offsets = [0, 32], sizes = [8, 32], strides = [1, 1]} : vector<8x128xf32> to vector<8x32xf32>
    %44 = vector.extract_strided_slice %41 {offsets = [0, 96], sizes = [8, 32], strides = [1, 1]} : vector<8x128xf32> to vector<8x32xf32>
    %45 = vector.extract_strided_slice %34 {offsets = [0, 64], sizes = [8, 32], strides = [1, 1]} : vector<8x128xf32> to vector<8x32xf32>
    %46 = math.tanh %45 : vector<8x32xf32>
    %47 = arith.mulf %43, %26 : vector<8x32xf32>
    %48 = arith.mulf %42, %46 : vector<8x32xf32>
    %49 = arith.addf %47, %48 : vector<8x32xf32>
    %50 = math.tanh %49 : vector<8x32xf32>
    %51 = arith.mulf %44, %50 : vector<8x32xf32>
    %c2_i32 = arith.constant 2 : i32
    %52 = arith.truncf %51 : vector<8x32xf32> to vector<8x32xbf16>
    %cst_18 = arith.constant dense<0.000000e+00> : vector<8x128xf32>
    %53 = tpu.matmul %52, %3, %cst_18 {dimension_numbers = #tpu.dot_dimension_numbers<[1], [0], [0], [1], [0, 0, 1, 1], [], []>} : vector<8x32xbf16>, vector<32x128xbf16>, vector<8x128xf32> -> vector<8x128xf32>
    %54 = arith.index_cast %c2_i32 : i32 to index
    %c0_19 = arith.constant 0 : index
    %c0_20 = arith.constant 0 : index
    %55 = vector.load %arg2[%54, %c0_19, %c0_20] : memref<8x8x128xf32, #tpu.memory_space<vmem>>, vector<1x8x128xf32>
    %56 = vector.shape_cast %55 : vector<1x8x128xf32> to vector<8x128xf32>
    %57 = arith.addf %56, %53 : vector<8x128xf32>
    %cst_21 = arith.constant 5.000000e-01 : f32
    %58 = vector.broadcast %cst_21 : f32 to vector<8x128xf32>
    %59 = arith.mulf %58, %57 : vector<8x128xf32>
    %60 = math.tanh %59 : vector<8x128xf32>
    %cst_22 = arith.constant 5.000000e-01 : f32
    %61 = vector.broadcast %cst_22 : f32 to vector<8x128xf32>
    %62 = arith.mulf %61, %60 : vector<8x128xf32>
    %cst_23 = arith.constant 5.000000e-01 : f32
    %63 = vector.broadcast %cst_23 : f32 to vector<8x128xf32>
    %64 = arith.addf %62, %63 : vector<8x128xf32>
    %65 = vector.extract_strided_slice %64 {offsets = [0, 0], sizes = [8, 32], strides = [1, 1]} : vector<8x128xf32> to vector<8x32xf32>
    %66 = vector.extract_strided_slice %64 {offsets = [0, 32], sizes = [8, 32], strides = [1, 1]} : vector<8x128xf32> to vector<8x32xf32>
    %67 = vector.extract_strided_slice %64 {offsets = [0, 96], sizes = [8, 32], strides = [1, 1]} : vector<8x128xf32> to vector<8x32xf32>
    %68 = vector.extract_strided_slice %57 {offsets = [0, 64], sizes = [8, 32], strides = [1, 1]} : vector<8x128xf32> to vector<8x32xf32>
    %69 = math.tanh %68 : vector<8x32xf32>
    %70 = arith.mulf %66, %49 : vector<8x32xf32>
    %71 = arith.mulf %65, %69 : vector<8x32xf32>
    %72 = arith.addf %70, %71 : vector<8x32xf32>
    %73 = math.tanh %72 : vector<8x32xf32>
    %74 = arith.mulf %67, %73 : vector<8x32xf32>
    %c3_i32 = arith.constant 3 : i32
    %75 = arith.truncf %74 : vector<8x32xf32> to vector<8x32xbf16>
    %cst_24 = arith.constant dense<0.000000e+00> : vector<8x128xf32>
    %76 = tpu.matmul %75, %3, %cst_24 {dimension_numbers = #tpu.dot_dimension_numbers<[1], [0], [0], [1], [0, 0, 1, 1], [], []>} : vector<8x32xbf16>, vector<32x128xbf16>, vector<8x128xf32> -> vector<8x128xf32>
    %77 = arith.index_cast %c3_i32 : i32 to index
    %c0_25 = arith.constant 0 : index
    %c0_26 = arith.constant 0 : index
    %78 = vector.load %arg2[%77, %c0_25, %c0_26] : memref<8x8x128xf32, #tpu.memory_space<vmem>>, vector<1x8x128xf32>
    %79 = vector.shape_cast %78 : vector<1x8x128xf32> to vector<8x128xf32>
    %80 = arith.addf %79, %76 : vector<8x128xf32>
    %cst_27 = arith.constant 5.000000e-01 : f32
    %81 = vector.broadcast %cst_27 : f32 to vector<8x128xf32>
    %82 = arith.mulf %81, %80 : vector<8x128xf32>
    %83 = math.tanh %82 : vector<8x128xf32>
    %cst_28 = arith.constant 5.000000e-01 : f32
    %84 = vector.broadcast %cst_28 : f32 to vector<8x128xf32>
    %85 = arith.mulf %84, %83 : vector<8x128xf32>
    %cst_29 = arith.constant 5.000000e-01 : f32
    %86 = vector.broadcast %cst_29 : f32 to vector<8x128xf32>
    %87 = arith.addf %85, %86 : vector<8x128xf32>
    %88 = vector.extract_strided_slice %87 {offsets = [0, 0], sizes = [8, 32], strides = [1, 1]} : vector<8x128xf32> to vector<8x32xf32>
    %89 = vector.extract_strided_slice %87 {offsets = [0, 32], sizes = [8, 32], strides = [1, 1]} : vector<8x128xf32> to vector<8x32xf32>
    %90 = vector.extract_strided_slice %87 {offsets = [0, 96], sizes = [8, 32], strides = [1, 1]} : vector<8x128xf32> to vector<8x32xf32>
    %91 = vector.extract_strided_slice %80 {offsets = [0, 64], sizes = [8, 32], strides = [1, 1]} : vector<8x128xf32> to vector<8x32xf32>
    %92 = math.tanh %91 : vector<8x32xf32>
    %93 = arith.mulf %89, %72 : vector<8x32xf32>
    %94 = arith.mulf %88, %92 : vector<8x32xf32>
    %95 = arith.addf %93, %94 : vector<8x32xf32>
    %96 = math.tanh %95 : vector<8x32xf32>
    %97 = arith.mulf %90, %96 : vector<8x32xf32>
    %c4_i32 = arith.constant 4 : i32
    %98 = arith.truncf %97 : vector<8x32xf32> to vector<8x32xbf16>
    %cst_30 = arith.constant dense<0.000000e+00> : vector<8x128xf32>
    %99 = tpu.matmul %98, %3, %cst_30 {dimension_numbers = #tpu.dot_dimension_numbers<[1], [0], [0], [1], [0, 0, 1, 1], [], []>} : vector<8x32xbf16>, vector<32x128xbf16>, vector<8x128xf32> -> vector<8x128xf32>
    %100 = arith.index_cast %c4_i32 : i32 to index
    %c0_31 = arith.constant 0 : index
    %c0_32 = arith.constant 0 : index
    %101 = vector.load %arg2[%100, %c0_31, %c0_32] : memref<8x8x128xf32, #tpu.memory_space<vmem>>, vector<1x8x128xf32>
    %102 = vector.shape_cast %101 : vector<1x8x128xf32> to vector<8x128xf32>
    %103 = arith.addf %102, %99 : vector<8x128xf32>
    %cst_33 = arith.constant 5.000000e-01 : f32
    %104 = vector.broadcast %cst_33 : f32 to vector<8x128xf32>
    %105 = arith.mulf %104, %103 : vector<8x128xf32>
    %106 = math.tanh %105 : vector<8x128xf32>
    %cst_34 = arith.constant 5.000000e-01 : f32
    %107 = vector.broadcast %cst_34 : f32 to vector<8x128xf32>
    %108 = arith.mulf %107, %106 : vector<8x128xf32>
    %cst_35 = arith.constant 5.000000e-01 : f32
    %109 = vector.broadcast %cst_35 : f32 to vector<8x128xf32>
    %110 = arith.addf %108, %109 : vector<8x128xf32>
    %111 = vector.extract_strided_slice %110 {offsets = [0, 0], sizes = [8, 32], strides = [1, 1]} : vector<8x128xf32> to vector<8x32xf32>
    %112 = vector.extract_strided_slice %110 {offsets = [0, 32], sizes = [8, 32], strides = [1, 1]} : vector<8x128xf32> to vector<8x32xf32>
    %113 = vector.extract_strided_slice %110 {offsets = [0, 96], sizes = [8, 32], strides = [1, 1]} : vector<8x128xf32> to vector<8x32xf32>
    %114 = vector.extract_strided_slice %103 {offsets = [0, 64], sizes = [8, 32], strides = [1, 1]} : vector<8x128xf32> to vector<8x32xf32>
    %115 = math.tanh %114 : vector<8x32xf32>
    %116 = arith.mulf %112, %95 : vector<8x32xf32>
    %117 = arith.mulf %111, %115 : vector<8x32xf32>
    %118 = arith.addf %116, %117 : vector<8x32xf32>
    %119 = math.tanh %118 : vector<8x32xf32>
    %120 = arith.mulf %113, %119 : vector<8x32xf32>
    %c5_i32 = arith.constant 5 : i32
    %121 = arith.truncf %120 : vector<8x32xf32> to vector<8x32xbf16>
    %cst_36 = arith.constant dense<0.000000e+00> : vector<8x128xf32>
    %122 = tpu.matmul %121, %3, %cst_36 {dimension_numbers = #tpu.dot_dimension_numbers<[1], [0], [0], [1], [0, 0, 1, 1], [], []>} : vector<8x32xbf16>, vector<32x128xbf16>, vector<8x128xf32> -> vector<8x128xf32>
    %123 = arith.index_cast %c5_i32 : i32 to index
    %c0_37 = arith.constant 0 : index
    %c0_38 = arith.constant 0 : index
    %124 = vector.load %arg2[%123, %c0_37, %c0_38] : memref<8x8x128xf32, #tpu.memory_space<vmem>>, vector<1x8x128xf32>
    %125 = vector.shape_cast %124 : vector<1x8x128xf32> to vector<8x128xf32>
    %126 = arith.addf %125, %122 : vector<8x128xf32>
    %cst_39 = arith.constant 5.000000e-01 : f32
    %127 = vector.broadcast %cst_39 : f32 to vector<8x128xf32>
    %128 = arith.mulf %127, %126 : vector<8x128xf32>
    %129 = math.tanh %128 : vector<8x128xf32>
    %cst_40 = arith.constant 5.000000e-01 : f32
    %130 = vector.broadcast %cst_40 : f32 to vector<8x128xf32>
    %131 = arith.mulf %130, %129 : vector<8x128xf32>
    %cst_41 = arith.constant 5.000000e-01 : f32
    %132 = vector.broadcast %cst_41 : f32 to vector<8x128xf32>
    %133 = arith.addf %131, %132 : vector<8x128xf32>
    %134 = vector.extract_strided_slice %133 {offsets = [0, 0], sizes = [8, 32], strides = [1, 1]} : vector<8x128xf32> to vector<8x32xf32>
    %135 = vector.extract_strided_slice %133 {offsets = [0, 32], sizes = [8, 32], strides = [1, 1]} : vector<8x128xf32> to vector<8x32xf32>
    %136 = vector.extract_strided_slice %133 {offsets = [0, 96], sizes = [8, 32], strides = [1, 1]} : vector<8x128xf32> to vector<8x32xf32>
    %137 = vector.extract_strided_slice %126 {offsets = [0, 64], sizes = [8, 32], strides = [1, 1]} : vector<8x128xf32> to vector<8x32xf32>
    %138 = math.tanh %137 : vector<8x32xf32>
    %139 = arith.mulf %135, %118 : vector<8x32xf32>
    %140 = arith.mulf %134, %138 : vector<8x32xf32>
    %141 = arith.addf %139, %140 : vector<8x32xf32>
    %142 = math.tanh %141 : vector<8x32xf32>
    %143 = arith.mulf %136, %142 : vector<8x32xf32>
    %c6_i32 = arith.constant 6 : i32
    %144 = arith.truncf %143 : vector<8x32xf32> to vector<8x32xbf16>
    %cst_42 = arith.constant dense<0.000000e+00> : vector<8x128xf32>
    %145 = tpu.matmul %144, %3, %cst_42 {dimension_numbers = #tpu.dot_dimension_numbers<[1], [0], [0], [1], [0, 0, 1, 1], [], []>} : vector<8x32xbf16>, vector<32x128xbf16>, vector<8x128xf32> -> vector<8x128xf32>
    %146 = arith.index_cast %c6_i32 : i32 to index
    %c0_43 = arith.constant 0 : index
    %c0_44 = arith.constant 0 : index
    %147 = vector.load %arg2[%146, %c0_43, %c0_44] : memref<8x8x128xf32, #tpu.memory_space<vmem>>, vector<1x8x128xf32>
    %148 = vector.shape_cast %147 : vector<1x8x128xf32> to vector<8x128xf32>
    %149 = arith.addf %148, %145 : vector<8x128xf32>
    %cst_45 = arith.constant 5.000000e-01 : f32
    %150 = vector.broadcast %cst_45 : f32 to vector<8x128xf32>
    %151 = arith.mulf %150, %149 : vector<8x128xf32>
    %152 = math.tanh %151 : vector<8x128xf32>
    %cst_46 = arith.constant 5.000000e-01 : f32
    %153 = vector.broadcast %cst_46 : f32 to vector<8x128xf32>
    %154 = arith.mulf %153, %152 : vector<8x128xf32>
    %cst_47 = arith.constant 5.000000e-01 : f32
    %155 = vector.broadcast %cst_47 : f32 to vector<8x128xf32>
    %156 = arith.addf %154, %155 : vector<8x128xf32>
    %157 = vector.extract_strided_slice %156 {offsets = [0, 0], sizes = [8, 32], strides = [1, 1]} : vector<8x128xf32> to vector<8x32xf32>
    %158 = vector.extract_strided_slice %156 {offsets = [0, 32], sizes = [8, 32], strides = [1, 1]} : vector<8x128xf32> to vector<8x32xf32>
    %159 = vector.extract_strided_slice %156 {offsets = [0, 96], sizes = [8, 32], strides = [1, 1]} : vector<8x128xf32> to vector<8x32xf32>
    %160 = vector.extract_strided_slice %149 {offsets = [0, 64], sizes = [8, 32], strides = [1, 1]} : vector<8x128xf32> to vector<8x32xf32>
    %161 = math.tanh %160 : vector<8x32xf32>
    %162 = arith.mulf %158, %141 : vector<8x32xf32>
    %163 = arith.mulf %157, %161 : vector<8x32xf32>
    %164 = arith.addf %162, %163 : vector<8x32xf32>
    %165 = math.tanh %164 : vector<8x32xf32>
    %166 = arith.mulf %159, %165 : vector<8x32xf32>
    %c7_i32 = arith.constant 7 : i32
    %167 = arith.truncf %166 : vector<8x32xf32> to vector<8x32xbf16>
    %cst_48 = arith.constant dense<0.000000e+00> : vector<8x128xf32>
    %168 = tpu.matmul %167, %3, %cst_48 {dimension_numbers = #tpu.dot_dimension_numbers<[1], [0], [0], [1], [0, 0, 1, 1], [], []>} : vector<8x32xbf16>, vector<32x128xbf16>, vector<8x128xf32> -> vector<8x128xf32>
    %169 = arith.index_cast %c7_i32 : i32 to index
    %c0_49 = arith.constant 0 : index
    %c0_50 = arith.constant 0 : index
    %170 = vector.load %arg2[%169, %c0_49, %c0_50] : memref<8x8x128xf32, #tpu.memory_space<vmem>>, vector<1x8x128xf32>
    %171 = vector.shape_cast %170 : vector<1x8x128xf32> to vector<8x128xf32>
    %172 = arith.addf %171, %168 : vector<8x128xf32>
    %cst_51 = arith.constant 5.000000e-01 : f32
    %173 = vector.broadcast %cst_51 : f32 to vector<8x128xf32>
    %174 = arith.mulf %173, %172 : vector<8x128xf32>
    %175 = math.tanh %174 : vector<8x128xf32>
    %cst_52 = arith.constant 5.000000e-01 : f32
    %176 = vector.broadcast %cst_52 : f32 to vector<8x128xf32>
    %177 = arith.mulf %176, %175 : vector<8x128xf32>
    %cst_53 = arith.constant 5.000000e-01 : f32
    %178 = vector.broadcast %cst_53 : f32 to vector<8x128xf32>
    %179 = arith.addf %177, %178 : vector<8x128xf32>
    %180 = vector.extract_strided_slice %179 {offsets = [0, 0], sizes = [8, 32], strides = [1, 1]} : vector<8x128xf32> to vector<8x32xf32>
    %181 = vector.extract_strided_slice %179 {offsets = [0, 32], sizes = [8, 32], strides = [1, 1]} : vector<8x128xf32> to vector<8x32xf32>
    %182 = vector.extract_strided_slice %179 {offsets = [0, 96], sizes = [8, 32], strides = [1, 1]} : vector<8x128xf32> to vector<8x32xf32>
    %183 = vector.extract_strided_slice %172 {offsets = [0, 64], sizes = [8, 32], strides = [1, 1]} : vector<8x128xf32> to vector<8x32xf32>
    %184 = math.tanh %183 : vector<8x32xf32>
    %185 = arith.mulf %181, %164 : vector<8x32xf32>
    %186 = arith.mulf %180, %184 : vector<8x32xf32>
    %187 = arith.addf %185, %186 : vector<8x32xf32>
    %188 = math.tanh %187 : vector<8x32xf32>
    %189 = arith.mulf %182, %188 : vector<8x32xf32>
    %c8_i32 = arith.constant 8 : i32
    %c0_54 = arith.constant 0 : index
    %c0_55 = arith.constant 0 : index
    %190 = vector.load %arg5[%c0_54, %c0_55] : memref<8x32xf32, #tpu.memory_space<vmem>>, vector<8x32xf32>
    tpu.vector_store %arg5[%c0_54, %c0_55], %189 {strides = array<i32>} : memref<8x32xf32, #tpu.memory_space<vmem>>, vector<8x32xf32>,
    %c0_56 = arith.constant 0 : index
    %c0_57 = arith.constant 0 : index
    %191 = vector.load %arg6[%c0_56, %c0_57] : memref<8x32xf32, #tpu.memory_space<vmem>>, vector<8x32xf32>
    tpu.vector_store %arg6[%c0_56, %c0_57], %187 {strides = array<i32>} : memref<8x32xf32, #tpu.memory_space<vmem>>, vector<8x32xf32>,
    %c0_i32_58 = arith.constant 0 : i32
    %192 = arith.cmpi eq, %arg1, %c0_i32_58 : i32
    %193 = arith.extui %192 : i1 to i32
    %c0_i32_59 = arith.constant 0 : i32
    %194 = arith.cmpi ne, %193, %c0_i32_59 : i32
    scf.if %194 {
      %c0_60 = arith.constant 0 : index
      %c0_61 = arith.constant 0 : index
      %195 = vector.load %arg4[%c0_60, %c0_61] : memref<8x32xf32, #tpu.memory_space<vmem>>, vector<8x32xf32>
      tpu.vector_store %arg4[%c0_60, %c0_61], %189 {strides = array<i32>} : memref<8x32xf32, #tpu.memory_space<vmem>>, vector<8x32xf32>,
    } else {
    }
    return
  }
  func.func @transform_0(%arg0: i32, %arg1: i32) -> (i32, i32, i32) {
    %c0_i32 = arith.constant 0 : i32
    %c0_i32_0 = arith.constant 0 : i32
    return %arg1, %arg0, %c0_i32 : i32, i32, i32
  }
  func.func @transform_1(%arg0: i32, %arg1: i32) -> (i32, i32) {
    %c0_i32 = arith.constant 0 : i32
    %c0_i32_0 = arith.constant 0 : i32
    %c0_i32_1 = arith.constant 0 : i32
    return %c0_i32, %c0_i32_0 : i32, i32
  }
  func.func @transform_2(%arg0: i32, %arg1: i32) -> (i32, i32) {
    %c0_i32 = arith.constant 0 : i32
    %c0_i32_0 = arith.constant 0 : i32
    return %arg0, %c0_i32 : i32, i32
  }
}

</mosaic_0001>

<bundles_post_ra>
// kernel: text_encoder_forward.1
= control target key start
LH: loop header
LB: loop body
LE: loop exit
PB: predicated region body
PF: predicated region fallthrough
CT: control target
= control target key end

     0   :  { %vm16_vm0 = vcmask 261120   ;;  %v792_v0 = vmov 0.0   ;;  %vm793_vm1 = vmmov 0   ;;  %s794_s14 = smov 64   ;;  %s795_s15 = smov 32   ;;  %s945_s1 = inlined_call_operand.vmem [shape: bf16[32,128], index: 1, kind: input, shape index: {}]   ;;  %s946_s0 = inlined_call_operand.vmem [shape: f32[8,8,128], index: 0, kind: input, shape index: {}]   ;;  %s947_s2 = inlined_call_operand.vmem [shape: f32[8,32], index: 2, kind: output, shape index: {}]  }
   0x1   :  { %673 = vmatprep.subr.bf16.mxu0 %v792_v0  ;;  %v816_v1 = vld [vmem:[%s945_s1] sm:$0xff]   ;;  %677 = vmatprep.mubr.msk.bf16.mxu0 %vm793_vm1, %v792_v0  ;;  %17 = vst.msk [vmem:[#allocation2] sm:$0xff] %vm16_vm0, %v792_v0  ;;  %18 = vst.msk [vmem:[#allocation3] sm:$0xff] %vm16_vm0, %v792_v0  ;;  %v831_v2 = vld [vmem:[%s945_s1 + $0x8] sm:$0xff]  }
   0x2   :  { %681 = vmatprep.subr.bf16.mxu1 %v792_v0  ;;  %685 = vmatprep.mubr.msk.bf16.mxu1 %vm793_vm1, %v792_v0  ;;  %v82_v5 = vld [vmem:[%s946_s0] sm:$0xff]  ;;  %v636_v28 = vld [vmem:[%s946_s0 + $0x8] sm:$0xff]  ;;  %v638_v49 = vld [vmem:[%s946_s0 + $0x10] sm:$0xff] }
   0x3   :  { %674 = vmatpush3.bf16.msra.mxu0 %v816_v1  ;;  %682 = vmatpush3.bf16.msra.mxu1 %v816_v1 }
   0x4   :  { %675 = vmatprep.subr.bf16.mxu0 %v792_v0  ;;  %683 = vmatprep.subr.bf16.mxu1 %v792_v0 }
   0x7   :  { %676 = vmatpush3.bf16.msra.mxu0 %v831_v2  ;;  %684 = vmatpush3.bf16.msra.mxu1 %v831_v2 }
   0x8   :  { %v23_v3 = vld [vmem:[#allocation2] sm:$0xff]  ;;  %689 = vmatprep.subr.bf16.mxu0 %v792_v0  ;;  %697 = vmatprep.subr.bf16.mxu1 %v792_v0  ;;  %v24_v12 = vld [vmem:[#allocation3] sm:$0xff] }
   0x9   :  { %v25_v4 = vpack.c.bf16 %v23_v3, %v23_v3 }
   0xb   :  { %678 = vmatmul.mubr.msk.bf16.vlgmr.msra.gmra.mrb[0].mxu0 %vm16_vm0, %v25_v4 }
   0xc   :  { %690 = vmatpush3.bf16.msra.mxu0 %v816_v1  ;;  %693 = vmatprep.mubr.msk.bf16.mxu0 %vm793_vm1, %v792_v0 }
   0xd   :  { %691 = vmatprep.subr.bf16.mxu0 %v792_v0 }
  0x10   :  { %692 = vmatpush3.bf16.msra.mxu0 %v831_v2 }
  0x11   :  { %705 = vmatprep.subr.bf16.mxu0 %v792_v0 }
  0xde   :  { %v76_v6 = vpop.f32.mrb[0].mxu0 }
  0xdf   :  { %v83_v7 = vadd.f32 %v82_v5, %v76_v6  ;;  %v679_v8 = vpop.f32.mrb[1].mxu0 }
  0xe0   :  { %v79_v9 = vpop.f32.mrb[2].mxu0 }
  0xe1   :  { %744 = vtanh.f32 %v83_v7  ;;  %v680_v10 = vpop.f32.mrb[3].mxu0  ;;  %v84_v13 = vmul.f32 0.5, %v83_v7  ;;  %v640_v9 = vld [vmem:[%s946_s0 + $0x18] sm:$0xff] }
  0xe3   :  { %746 = vtanh.f32 %v84_v13 }
  0xeb   :  { %v745_v11 = vpop.eup %744 }
  0xec   :  { %95 = vrot.lane.b32.xlu0 %v745_v11, %s794_s14 }
  0xed   :  { %v747_v14 = vpop.eup %746 }
  0xee   :  { %v86_v15 = vmul.f32 0.5, %v747_v14 }
  0xf0   :  { %90 = vrot.lane.b32.xlu0 %v24_v12, %s795_s15  ;;  %v87_v16 = vadd.f32 0.5, %v86_v15 }
 0x15e   :  { %v96_v17 = vpop.permute.xlu0 %95 }
 0x15f   :  { %v98_v18 = vmul.f32 %v96_v17, %v87_v16 }
 0x161   :  { %100 = vrot.lane.b32.xlu1 %v98_v18, %s795_s15 }
 0x162   :  { %v91_v19 = vpop.permute.xlu0 %90 }
 0x163   :  { %v93_v20 = vmul.f32 %v91_v19, %v87_v16 }
 0x1d3   :  { %v101_v21 = vpop.permute.xlu1 %100 }
 0x1d4   :  { %v103_v22 = vadd.f32 %v101_v21, %v93_v20 }
 0x1d6   :  { %748 = vtanh.f32 %v103_v22 }
 0x1e0   :  { %v749_v23 = vpop.eup %748 }
 0x1e1   :  { %106 = vrot.lane.b32.xlu1 %v749_v23, %s794_s14 }
 0x253   :  { %v107_v24 = vpop.permute.xlu1 %106 }
 0x254   :  { %v109_v25 = vmul.f32 %v107_v24, %v87_v16 }
 0x256   :  { %v110_v26 = vpack.c.bf16 %v109_v25, %v109_v25 }
 0x258   :  { %112 = vrot.lane.b32.xlu0 %v110_v26, %s795_s15 }
 0x2ca   :  { %v113_v27 = vpop.permute.xlu0 %112 }
 0x2cb   :  { %686 = vmatmul.mubr.msk.bf16.vlgmr.msra.gmra.mrb[0].mxu1 %vm16_vm0, %v113_v27 }
 0x2cc   :  { %698 = vmatpush3.bf16.msra.mxu1 %v816_v1  ;;  %701 = vmatprep.mubr.msk.bf16.mxu1 %vm793_vm1, %v792_v0 }
 0x2cd   :  { %699 = vmatprep.subr.bf16.mxu1 %v792_v0 }
 0x2d0   :  { %700 = vmatpush3.bf16.msra.mxu1 %v831_v2 }
 0x2d1   :  { %713 = vmatprep.subr.bf16.mxu1 %v792_v0 }
 0x39e   :  { %v151_v29 = vpop.f32.mrb[0].mxu1 }
 0x39f   :  { %v159_v30 = vadd.f32 %v636_v28, %v151_v29  ;;  %v687_v31 = vpop.f32.mrb[1].mxu1 }
 0x3a0   :  { %v154_v32 = vpop.f32.mrb[2].mxu1 }
 0x3a1   :  { %750 = vtanh.f32 %v159_v30  ;;  %v688_v33 = vpop.f32.mrb[3].mxu1  ;;  %v160_v35 = vmul.f32 0.5, %v159_v30  ;;  %v642_v30 = vld [vmem:[%s946_s0 + $0x20] sm:$0xff] }
 0x3a3   :  { %752 = vtanh.f32 %v160_v35 }
 0x3ab   :  { %v751_v34 = vpop.eup %750 }
 0x3ac   :  { %167 = vrot.lane.b32.xlu1 %v751_v34, %s794_s14 }
 0x3ad   :  { %v753_v36 = vpop.eup %752 }
 0x3ae   :  { %v162_v37 = vmul.f32 0.5, %v753_v36 }
 0x3b0   :  { %v163_v38 = vadd.f32 0.5, %v162_v37 }
 0x3b2   :  { %v165_v41 = vmul.f32 %v163_v38, %v103_v22 }
 0x41e   :  { %v168_v39 = vpop.permute.xlu1 %167 }
 0x41f   :  { %v170_v40 = vmul.f32 %v168_v39, %v163_v38 }
 0x421   :  { %172 = vrot.lane.b32.xlu0 %v170_v40, %s795_s15 }
 0x493   :  { %v173_v42 = vpop.permute.xlu0 %172 }
 0x494   :  { %v175_v43 = vadd.f32 %v173_v42, %v165_v41 }
 0x496   :  { %754 = vtanh.f32 %v175_v43 }
 0x4a0   :  { %v755_v44 = vpop.eup %754 }
 0x4a1   :  { %178 = vrot.lane.b32.xlu1 %v755_v44, %s794_s14 }
 0x513   :  { %v179_v45 = vpop.permute.xlu1 %178 }
 0x514   :  { %v181_v46 = vmul.f32 %v179_v45, %v163_v38 }
 0x516   :  { %v182_v47 = vpack.c.bf16 %v181_v46, %v181_v46 }
 0x518   :  { %184 = vrot.lane.b32.xlu0 %v182_v47, %s795_s15 }
 0x58a   :  { %v185_v48 = vpop.permute.xlu0 %184 }
 0x58b   :  { %694 = vmatmul.mubr.msk.bf16.vlgmr.msra.gmra.mrb[4].mxu0 %vm16_vm0, %v185_v48 }
 0x58c   :  { %706 = vmatpush3.bf16.msra.mxu0 %v816_v1  ;;  %709 = vmatprep.mubr.msk.bf16.mxu0 %vm793_vm1, %v792_v0 }
 0x58d   :  { %707 = vmatprep.subr.bf16.mxu0 %v792_v0 }
 0x590   :  { %708 = vmatpush3.bf16.msra.mxu0 %v831_v2 }
 0x591   :  { %721 = vmatprep.subr.bf16.mxu0 %v792_v0 }
 0x65e   :  { %v223_v50 = vpop.f32.mrb[4].mxu0 }
 0x65f   :  { %v231_v51 = vadd.f32 %v638_v49, %v223_v50  ;;  %v695_v52 = vpop.f32.mrb[5].mxu0 }
 0x660   :  { %v226_v53 = vpop.f32.mrb[6].mxu0 }
 0x661   :  { %756 = vtanh.f32 %v231_v51  ;;  %v696_v54 = vpop.f32.mrb[7].mxu0  ;;  %v232_v56 = vmul.f32 0.5, %v231_v51  ;;  %v644_v51 = vld [vmem:[%s946_s0 + $0x28] sm:$0xff] }
 0x663   :  { %758 = vtanh.f32 %v232_v56 }
 0x66b   :  { %v757_v55 = vpop.eup %756 }
 0x66c   :  { %239 = vrot.lane.b32.xlu1 %v757_v55, %s794_s14 }
 0x66d   :  { %v759_v57 = vpop.eup %758 }
 0x66e   :  { %v234_v58 = vmul.f32 0.5, %v759_v57 }
 0x670   :  { %v235_v59 = vadd.f32 0.5, %v234_v58 }
 0x672   :  { %v237_v62 = vmul.f32 %v235_v59, %v175_v43 }
 0x6de   :  { %v240_v60 = vpop.permute.xlu1 %239 }
 0x6df   :  { %v242_v61 = vmul.f32 %v240_v60, %v235_v59 }
 0x6e1   :  { %244 = vrot.lane.b32.xlu0 %v242_v61, %s795_s15 }
 0x753   :  { %v245_v63 = vpop.permute.xlu0 %244 }
 0x754   :  { %v247_v3 = vadd.f32 %v245_v63, %v237_v62 }
 0x756   :  { %760 = vtanh.f32 %v247_v3 }
 0x760   :  { %v761_v4 = vpop.eup %760 }
 0x761   :  { %250 = vrot.lane.b32.xlu1 %v761_v4, %s794_s14 }
 0x7d3   :  { %v251_v5 = vpop.permute.xlu1 %250 }
 0x7d4   :  { %v253_v6 = vmul.f32 %v251_v5, %v235_v59 }
 0x7d6   :  { %v254_v7 = vpack.c.bf16 %v253_v6, %v253_v6 }
 0x7d8   :  { %256 = vrot.lane.b32.xlu0 %v254_v7, %s795_s15 }
 0x84a   :  { %v257_v8 = vpop.permute.xlu0 %256 }
 0x84b   :  { %702 = vmatmul.mubr.msk.bf16.vlgmr.msra.gmra.mrb[4].mxu1 %vm16_vm0, %v257_v8  ;;  %v646_v8 = vld [vmem:[%s946_s0 + $0x30] sm:$0xff] }
 0x84c   :  { %714 = vmatpush3.bf16.msra.mxu1 %v816_v1  ;;  %717 = vmatprep.mubr.msk.bf16.mxu1 %vm793_vm1, %v792_v0 }
 0x84d   :  { %715 = vmatprep.subr.bf16.mxu1 %v792_v0 }
 0x850   :  { %716 = vmatpush3.bf16.msra.mxu1 %v831_v2 }
 0x851   :  { %729 = vmatprep.subr.bf16.mxu1 %v792_v0 }
 0x91e   :  { %v295_v10 = vpop.f32.mrb[4].mxu1 }
 0x91f   :  { %v303_v11 = vadd.f32 %v640_v9, %v295_v10  ;;  %v703_v12 = vpop.f32.mrb[5].mxu1 }
 0x920   :  { %v298_v13 = vpop.f32.mrb[6].mxu1 }
 0x921   :  { %762 = vtanh.f32 %v303_v11  ;;  %v704_v14 = vpop.f32.mrb[7].mxu1  ;;  %v304_v16 = vmul.f32 0.5, %v303_v11 }
 0x923   :  { %764 = vtanh.f32 %v304_v16 }
 0x92b   :  { %v763_v15 = vpop.eup %762 }
 0x92c   :  { %311 = vrot.lane.b32.xlu1 %v763_v15, %s794_s14 }
 0x92d   :  { %v765_v17 = vpop.eup %764 }
 0x92e   :  { %v306_v18 = vmul.f32 0.5, %v765_v17 }
 0x930   :  { %v307_v19 = vadd.f32 0.5, %v306_v18 }
 0x932   :  { %v309_v22 = vmul.f32 %v307_v19, %v247_v3 }
 0x99e   :  { %v312_v20 = vpop.permute.xlu1 %311 }
 0x99f   :  { %v314_v21 = vmul.f32 %v312_v20, %v307_v19 }
 0x9a1   :  { %316 = vrot.lane.b32.xlu0 %v314_v21, %s795_s15 }
 0xa13   :  { %v317_v23 = vpop.permute.xlu0 %316 }
 0xa14   :  { %v319_v24 = vadd.f32 %v317_v23, %v309_v22 }
 0xa16   :  { %766 = vtanh.f32 %v319_v24 }
 0xa20   :  { %v767_v25 = vpop.eup %766 }
 0xa21   :  { %322 = vrot.lane.b32.xlu1 %v767_v25, %s794_s14 }
 0xa93   :  { %v323_v26 = vpop.permute.xlu1 %322 }
 0xa94   :  { %v325_v27 = vmul.f32 %v323_v26, %v307_v19 }
 0xa96   :  { %v326_v28 = vpack.c.bf16 %v325_v27, %v325_v27 }
 0xa98   :  { %328 = vrot.lane.b32.xlu0 %v326_v28, %s795_s15 }
 0xb0a   :  { %v329_v29 = vpop.permute.xlu0 %328 }
 0xb0b   :  { %710 = vmatmul.mubr.msk.bf16.vlgmr.msra.gmra.mrb[8].mxu0 %vm16_vm0, %v329_v29  ;;  %v648_v29 = vld [vmem:[%s946_s0 + $0x38] sm:$0xff]  ;;  %s796_s0 = smov 96  }
 0xb0c   :  { %722 = vmatpush3.bf16.msra.mxu0 %v816_v1  ;;  %725 = vmatprep.mubr.msk.bf16.mxu0 %vm793_vm1, %v792_v0 }
 0xb0d   :  { %723 = vmatprep.subr.bf16.mxu0 %v792_v0 }
 0xb10   :  { %724 = vmatpush3.bf16.msra.mxu0 %v831_v2 }
 0xbde   :  { %v367_v31 = vpop.f32.mrb[8].mxu0 }
 0xbdf   :  { %v375_v32 = vadd.f32 %v642_v30, %v367_v31  ;;  %v711_v33 = vpop.f32.mrb[9].mxu0 }
 0xbe0   :  { %v370_v34 = vpop.f32.mrb[10].mxu0 }
 0xbe1   :  { %768 = vtanh.f32 %v375_v32  ;;  %v712_v35 = vpop.f32.mrb[11].mxu0  ;;  %v376_v37 = vmul.f32 0.5, %v375_v32 }
 0xbe3   :  { %770 = vtanh.f32 %v376_v37 }
 0xbeb   :  { %v769_v36 = vpop.eup %768 }
 0xbec   :  { %383 = vrot.lane.b32.xlu1 %v769_v36, %s794_s14 }
 0xbed   :  { %v771_v38 = vpop.eup %770 }
 0xbee   :  { %v378_v39 = vmul.f32 0.5, %v771_v38 }
 0xbf0   :  { %v379_v40 = vadd.f32 0.5, %v378_v39 }
 0xbf2   :  { %v381_v43 = vmul.f32 %v379_v40, %v319_v24 }
 0xc5e   :  { %v384_v41 = vpop.permute.xlu1 %383 }
 0xc5f   :  { %v386_v42 = vmul.f32 %v384_v41, %v379_v40 }
 0xc61   :  { %388 = vrot.lane.b32.xlu0 %v386_v42, %s795_s15 }
 0xcd3   :  { %v389_v44 = vpop.permute.xlu0 %388 }
 0xcd4   :  { %v391_v45 = vadd.f32 %v389_v44, %v381_v43 }
 0xcd6   :  { %772 = vtanh.f32 %v391_v45 }
 0xce0   :  { %v773_v46 = vpop.eup %772 }
 0xce1   :  { %394 = vrot.lane.b32.xlu1 %v773_v46, %s794_s14 }
 0xd53   :  { %v395_v47 = vpop.permute.xlu1 %394 }
 0xd54   :  { %v397_v48 = vmul.f32 %v395_v47, %v379_v40 }
 0xd56   :  { %v398_v49 = vpack.c.bf16 %v397_v48, %v397_v48 }
 0xd58   :  { %400 = vrot.lane.b32.xlu0 %v398_v49, %s795_s15 }
 0xdca   :  { %v401_v50 = vpop.permute.xlu0 %400 }
 0xdcb   :  { %718 = vmatmul.mubr.msk.bf16.vlgmr.msra.gmra.mrb[8].mxu1 %vm16_vm0, %v401_v50 }
 0xdcc   :  { %730 = vmatpush3.bf16.msra.mxu1 %v816_v1  ;;  %733 = vmatprep.mubr.msk.bf16.mxu1 %vm793_vm1, %v792_v0 }
 0xdcd   :  { %731 = vmatprep.subr.bf16.mxu1 %v792_v0 }
 0xdd0   :  { %732 = vmatpush3.bf16.msra.mxu1 %v831_v2 }
 0xe9e   :  { %v439_v52 = vpop.f32.mrb[8].mxu1 }
 0xe9f   :  { %v447_v53 = vadd.f32 %v644_v51, %v439_v52  ;;  %v719_v54 = vpop.f32.mrb[9].mxu1 }
 0xea0   :  { %v442_v55 = vpop.f32.mrb[10].mxu1 }
 0xea1   :  { %774 = vtanh.f32 %v447_v53  ;;  %v720_v56 = vpop.f32.mrb[11].mxu1  ;;  %v448_v1 = vmul.f32 0.5, %v447_v53 }
 0xea3   :  { %776 = vtanh.f32 %v448_v1 }
 0xeab   :  { %v775_v57 = vpop.eup %774 }
 0xeac   :  { %455 = vrot.lane.b32.xlu1 %v775_v57, %s794_s14 }
 0xead   :  { %v777_v58 = vpop.eup %776 }
 0xeae   :  { %v450_v59 = vmul.f32 0.5, %v777_v58 }
 0xeb0   :  { %v451_v0 = vadd.f32 0.5, %v450_v59 }
 0xeb2   :  { %v453_v61 = vmul.f32 %v451_v0, %v391_v45 }
 0xf1e   :  { %v456_v60 = vpop.permute.xlu1 %455 }
 0xf1f   :  { %v458_v2 = vmul.f32 %v456_v60, %v451_v0 }
 0xf21   :  { %460 = vrot.lane.b32.xlu0 %v458_v2, %s795_s15 }
 0xf93   :  { %v461_v62 = vpop.permute.xlu0 %460 }
 0xf94   :  { %v463_v63 = vadd.f32 %v461_v62, %v453_v61 }
 0xf96   :  { %778 = vtanh.f32 %v463_v63 }
 0xfa0   :  { %v779_v3 = vpop.eup %778 }
 0xfa1   :  { %466 = vrot.lane.b32.xlu1 %v779_v3, %s794_s14 }
0x1013   :  { %v467_v4 = vpop.permute.xlu1 %466 }
0x1014   :  { %v469_v5 = vmul.f32 %v467_v4, %v451_v0 }
0x1016   :  { %v470_v6 = vpack.c.bf16 %v469_v5, %v469_v5 }
0x1018   :  { %472 = vrot.lane.b32.xlu0 %v470_v6, %s795_s15 }
0x108a   :  { %v473_v7 = vpop.permute.xlu0 %472 }
0x108b   :  { %726 = vmatmul.mubr.msk.bf16.vlgmr.msra.gmra.mrb[12].mxu0 %vm16_vm0, %v473_v7 }
0x115e   :  { %v511_v9 = vpop.f32.mrb[12].mxu0 }
0x115f   :  { %v519_v10 = vadd.f32 %v646_v8, %v511_v9  ;;  %v727_v11 = vpop.f32.mrb[13].mxu0 }
0x1160   :  { %v514_v12 = vpop.f32.mrb[14].mxu0 }
0x1161   :  { %780 = vtanh.f32 %v519_v10  ;;  %v728_v13 = vpop.f32.mrb[15].mxu0  ;;  %v520_v15 = vmul.f32 0.5, %v519_v10 }
0x1163   :  { %782 = vtanh.f32 %v520_v15 }
0x116b   :  { %v781_v14 = vpop.eup %780 }
0x116c   :  { %527 = vrot.lane.b32.xlu1 %v781_v14, %s794_s14 }
0x116d   :  { %v783_v16 = vpop.eup %782 }
0x116e   :  { %v522_v17 = vmul.f32 0.5, %v783_v16 }
0x1170   :  { %v523_v18 = vadd.f32 0.5, %v522_v17 }
0x1172   :  { %v525_v21 = vmul.f32 %v523_v18, %v463_v63 }
0x11de   :  { %v528_v19 = vpop.permute.xlu1 %527 }
0x11df   :  { %v530_v20 = vmul.f32 %v528_v19, %v523_v18 }
0x11e1   :  { %532 = vrot.lane.b32.xlu0 %v530_v20, %s795_s15 }
0x1253   :  { %v533_v22 = vpop.permute.xlu0 %532 }
0x1254   :  { %v535_v23 = vadd.f32 %v533_v22, %v525_v21 }
0x1256   :  { %784 = vtanh.f32 %v535_v23 }
0x1260   :  { %v785_v24 = vpop.eup %784 }
0x1261   :  { %538 = vrot.lane.b32.xlu1 %v785_v24, %s794_s14 }
0x12d3   :  { %v539_v25 = vpop.permute.xlu1 %538 }
0x12d4   :  { %v541_v26 = vmul.f32 %v539_v25, %v523_v18 }
0x12d6   :  { %v542_v27 = vpack.c.bf16 %v541_v26, %v541_v26 }
0x12d8   :  { %544 = vrot.lane.b32.xlu0 %v542_v27, %s795_s15 }
0x134a   :  { %v545_v28 = vpop.permute.xlu0 %544 }
0x134b   :  { %734 = vmatmul.mubr.msk.bf16.vlgmr.msra.gmra.mrb[12].mxu1 %vm16_vm0, %v545_v28 }
0x141e   :  { %v583_v30 = vpop.f32.mrb[12].mxu1 }
0x141f   :  { %v591_v31 = vadd.f32 %v648_v29, %v583_v30  ;;  %v735_v32 = vpop.f32.mrb[13].mxu1 }
0x1420   :  { %v586_v33 = vpop.f32.mrb[14].mxu1 }
0x1421   :  { %786 = vtanh.f32 %v591_v31  ;;  %v736_v34 = vpop.f32.mrb[15].mxu1  ;;  %v592_v36 = vmul.f32 0.5, %v591_v31 }
0x1423   :  { %788 = vtanh.f32 %v592_v36 }
0x142b   :  { %v787_v35 = vpop.eup %786 }
0x142c   :  { %599 = vrot.lane.b32.xlu1 %v787_v35, %s794_s14 }
0x142d   :  { %v789_v37 = vpop.eup %788 }
0x142e   :  { %v594_v38 = vmul.f32 0.5, %v789_v37 }
0x1430   :  { %v595_v39 = vadd.f32 0.5, %v594_v38 }
0x1432   :  { %v597_v42 = vmul.f32 %v595_v39, %v535_v23 }
0x149e   :  { %v600_v40 = vpop.permute.xlu1 %599 }
0x149f   :  { %v602_v41 = vmul.f32 %v600_v40, %v595_v39 }
0x14a1   :  { %604 = vrot.lane.b32.xlu0 %v602_v41, %s795_s15 }
0x1513   :  { %v605_v43 = vpop.permute.xlu0 %604 }
0x1514   :  { %v607_v44 = vadd.f32 %v605_v43, %v597_v42 }
0x1516   :  { %790 = vtanh.f32 %v607_v44 }
0x1520   :  { %v791_v45 = vpop.eup %790 }
0x1521   :  { %610 = vrot.lane.b32.xlu1 %v791_v45, %s794_s14 }
0x1525   :  { %620 = vrot.lane.b32.xlu1 %v607_v44, %s796_s0 }
0x1593   :  { %v611_v46 = vpop.permute.xlu1 %610 }
0x1594   :  { %v613_v47 = vmul.f32 %v611_v46, %v595_v39 }
0x1596   :  { %615 = vrot.lane.b32.xlu0 %v613_v47, %s795_s15 }
0x1597   :  { %v621_v48 = vpop.permute.xlu1 %620 }
0x1598   :  { %623 = vst.msk [vmem:[#allocation3] sm:$0xff] %vm16_vm0, %v621_v48 }
0x1608   :  { %v616_v49 = vpop.permute.xlu0 %615 }
0x1609   :  { %618 = vst.msk [vmem:[#allocation2] sm:$0xff] %vm16_vm0, %v616_v49  ;;  %627 = vst.msk [vmem:[%s947_s2] sm:$0xff] %vm16_vm0, %v616_v49 }

</bundles_post_ra>
